<compile_context>
chip_gen: v6e
topology: v6e:2x2x1
jax: 0.10.0
libtpu: 0.0.40
codegen_flags: <defaults>
</compile_context>

<pallas_src>
import jax
import jax.numpy as jnp
from jax.experimental import pallas as pl
from jax.experimental.pallas import tpu as pltpu

_LANE = 128
_SUBLANE = 8
_BLOCK_BYTES = 4 * 1024 * 1024  # per output block (double-buffered by Pallas)


def _pos_emb_kernel(emb_ref, out_ref):
    # emb_ref : (1, TC)  -- lane-dense slab of the flattened positional rows
    # out_ref : (TB, TC) -- same slab replicated across a batch tile
    out_ref[...] = jnp.broadcast_to(emb_ref[...], out_ref.shape)


def _round_down(x, m):
    return (x // m) * m


def _choose_tiles(B, N, itemsize):
    """Pick (TB, TC) for output blocks of shape (TB, TC) over a (B, N) array."""
    # Batch tile: full B when small (block dim == full array dim is allowed),
    # otherwise a multiple of 8 (sublane rule); partial last block is masked.
    TB = B if B <= _SUBLANE else _SUBLANE
    # Column tile: as wide as the VMEM budget allows, multiple of 128 lanes
    # (or the full flattened dim when it is smaller than one lane group).
    budget_per_row = max(_LANE, _BLOCK_BYTES // (itemsize * TB))
    if N <= _LANE:
        TC = N  # equals full array dim -> satisfies the (8,128) rule
    else:
        TC = max(_LANE, min(_round_down(N, _LANE), _round_down(budget_per_row, _LANE)))
    return TB, TC


def learned_positional_embedding(x, emb_table):
    """x: [B, S, D] (only the shape is used); emb_table: [max_pos, D]."""
    B, S, D = x.shape
    max_pos, D_tab = emb_table.shape
    assert D == D_tab, "embedding_dim mismatch"
    assert S <= max_pos, "seq_len exceeds maximum_position"

    N = S * D
    # The "gather": positions = arange(S) -> first S rows of the table, flattened
    # into one lane-dense row.  Contiguous slice + reshape (negligible traffic).
    emb_flat = emb_table[:S].reshape(1, N)

    itemsize = jnp.dtype(emb_table.dtype).itemsize
    TB, TC = _choose_tiles(B, N, itemsize)

    # Column tiles outer, batch tiles inner -> emb block index is constant
    # across consecutive grid steps (stays resident in VMEM).
    grid = (pl.cdiv(N, TC), pl.cdiv(B, TB))

    out_flat = pl.pallas_call(
        _pos_emb_kernel,
        out_shape=jax.ShapeDtypeStruct((B, N), emb_table.dtype),
        grid=grid,
        in_specs=[
            pl.BlockSpec((1, TC), lambda c, b: (0, c)),
        ],
        out_specs=pl.BlockSpec((TB, TC), lambda c, b: (b, c)),
        compiler_params=pltpu.CompilerParams(
            dimension_semantics=("parallel", "parallel"),
        ),
    )(emb_flat)

    return out_flat.reshape(B, S, D)


if __name__ == "__main__":
    # Module config (small, consistent with the forward pass)
    embedding_dim = 32
    maximum_position = 512
    batch = 2
    seq_len = 8

    key = jax.random.PRNGKey(0)
    k_emb, k_x = jax.random.split(key)

    # Deterministic parameter init (nn.Embedding default: N(0, 1))
    emb_table = jax.random.normal(
        k_emb, (maximum_position, embedding_dim), dtype=jnp.float32
    )

    # Input tensor [batch, seq_len, dim]; only its shape is used by forward.
    x = jax.random.normal(k_x, (batch, seq_len, embedding_dim), dtype=jnp.float32)

    out = learned_positional_embedding(x, emb_table)
    out = jax.block_until_ready(out)

    # Reference: emb_table[arange(S)] broadcast over batch.
    ref = jnp.broadcast_to(
        emb_table[:seq_len][None, :, :], (batch, seq_len, embedding_dim)
    )
    assert out.shape == x.shape
    assert jnp.allclose(out, ref), "mismatch vs reference"

    print("KERNEL_OK")
</pallas_src>

<mosaic_0001>
module attributes {stable_mosaic.version = 11 : i64} {
  func.func @_pos_emb_kernel(%arg0: i32, %arg1: i32, %arg2: memref<1x256xf32, #tpu.memory_space<vmem>>, %arg3: memref<2x256xf32, #tpu.memory_space<vmem>>) attributes {dimension_semantics = [#tpu.dimension_semantics<parallel>, #tpu.dimension_semantics<parallel>], iteration_bounds = array<i64: 1, 1>, scalar_prefetch = 0 : i64, scratch_operands = 0 : i64, tpu.core_type = #tpu.core_type<tc>, window_params = [{transform_indices = @transform_0, window_bounds = array<i64: 1, 256>}, {transform_indices = @transform_1, window_bounds = array<i64: 2, 256>}]} {
    %c0 = arith.constant 0 : index
    %c0_0 = arith.constant 0 : index
    %0 = vector.load %arg2[%c0, %c0_0] : memref<1x256xf32, #tpu.memory_space<vmem>>, vector<1x256xf32>
    %1 = vector.shape_cast %0 : vector<1x256xf32> to vector<1x256xf32>
    %2 = vector.broadcast %1 : vector<1x256xf32> to vector<2x256xf32>
    %c0_1 = arith.constant 0 : index
    %c0_2 = arith.constant 0 : index
    %3 = vector.load %arg3[%c0_1, %c0_2] : memref<2x256xf32, #tpu.memory_space<vmem>>, vector<2x256xf32>
    tpu.vector_store %arg3[%c0_1, %c0_2], %2 {strides = array<i32>} : memref<2x256xf32, #tpu.memory_space<vmem>>, vector<2x256xf32>,
    return
  }
  func.func @transform_0(%arg0: i32, %arg1: i32) -> (i32, i32) {
    %c0_i32 = arith.constant 0 : i32
    %c0_i32_0 = arith.constant 0 : i32
    return %c0_i32, %arg0 : i32, i32
  }
  func.func @transform_1(%arg0: i32, %arg1: i32) -> (i32, i32) {
    %c0_i32 = arith.constant 0 : i32
    return %arg1, %arg0 : i32, i32
  }
}

</mosaic_0001>

<bundles_post_ra>
// kernel: tpu_custom_call.1
= control target key start
LH: loop header
LB: loop body
LE: loop exit
PB: predicated region body
PF: predicated region fallthrough
CT: control target
= control target key end

     0   :  { %6 = vsyncpa [#allocation3], 0  ;;  %s121_s0 = inlined_call_operand.hbm [shape: f32[1,256], index: 0, kind: input, shape index: {}]   ;;  %s122_s1 = inlined_call_operand.hbm [shape: f32[2,256], index: 1, kind: output, shape index: {}]  }
   0x1   :  { %7 = vsyncpa [#allocation4], 0  ;;  %s103_s6 = smov [#allocation2]  }
   0x2   :  { %s14_s7 = sshll.u32 %s103_s6, 4  ;;  %s15_s7 = int_to_ptr.vmem [resolvable:$true] %s14_s7 }
   0x3   :  { %s67_s8 = scalar_lea.vmem %s15_s7, 32  ;;  %p72_p1 = scmp.lt.s32.totalorder %s15_s7, %s15_s7 }
   0x4   :  { %p68_p0 = scmp.ne.s32.totalorder %s15_s7, %s67_s8  ;;  %p73_p2 = scmp.lt.s32.totalorder %s67_s8, %s67_s8 }
   0x6   :  { %p74_p3 = por %p73_p2, %p72_p1 }
   0x8   :  { %p75_p4 = pnand %p74_p3, %p68_p0 }
   0xa   :  { %78 = shalt.err (!%p75_p4)
}
   0xb   :  { %17 = dma.hbm_to_vmem [thread:$0]  %s121_s0, 32, %s15_s7, [#allocation3]  }
   0xc   :  { %99 = dma.done.wait [#allocation3], 32  }
   0xd   :  { %100 = vsyncadd [#allocation3], 4294967264  ;;  %v23_v0 = vlaneseq  ;;  %v21_v4 = vld [vmem:[#allocation2] sm:$0x3]  ;;  %s104_s11 = smov [#allocation5]  }
   0xe   :  { %s47_s12 = sshll.u32 %s104_s11, 4  ;;  %s48_s12 = int_to_ptr.vmem [resolvable:$true] %s47_s12 }
   0xf   :  { %v24_v1 = vshrl.u32 %v23_v0, 7  ;;  %s79_s13 = scalar_lea.vmem %s48_s12, 64  ;;  %p84_p6 = scmp.lt.s32.totalorder %s48_s12, %s48_s12 }
  0x10   :  { %p80_p5 = scmp.ne.s32.totalorder %s48_s12, %s79_s13  ;;  %p85_p7 = scmp.lt.s32.totalorder %s79_s13, %s79_s13 }
  0x11   :  { %v25_v2 = vsub.s32 0, %v24_v1  ;;  %v29_v3 = vsub.s32 1, %v24_v1 }
  0x12   :  { %p86_p8 = por %p85_p7, %p84_p6 }
  0x13   :  { %v26_v5 = vrot.slane %v21_v4, %v25_v2  ;;  %v30_v6 = vrot.slane %v21_v4, %v29_v3 }
  0x14   :  { %p87_p9 = pnand %p86_p8, %p80_p5 }
  0x15   :  { %v31_v7 = vcombine.low %v26_v5, %v30_v6 }
  0x17   :  { %56 = vst.sshfl [vmem:[#allocation5] sm:$0x33 pattern:$0x76325410] %v31_v7 }
  0x18   :  { %90 = shalt.err (!%p87_p9)
}
  0x19   :  { %50 = dma.vmem_to_hbm [thread:$0]  %s48_s12, 64, %s122_s1, [#allocation4]  }
  0x1a   :  { %101 = dma.done.wait [#allocation4], 64  }
  0x1b   :  { %102 = vsyncadd [#allocation4], 4294967232 }
  0x1c   :  { %54 = vsyncpa [#allocation3], 1 }
  0x1d   :  { %55 = vsyncpa [#allocation4], 1 }

</bundles_post_ra>
